<compile_context>
chip_gen: v5e
topology: v5e:2x2
jax: 0.10.0
libtpu: 0.0.40
codegen_flags: <defaults>
</compile_context>

<pallas_src>
import math

import numpy as np
import jax
import jax.numpy as jnp
from jax.experimental import pallas as pl
from jax.experimental.pallas import tpu as pltpu


def _ynet_kernel(sel_ref, x_ref, o_ref):
    """sel_ref: (w, g) f32 = theta * block-diagonal selector (loaded once);
    x_ref: (tb, w) input tile in its native dtype; o_ref: (tb, g) f32.

    Output column j is theta * sum(x[:, j*n:(j+1)*n] ** 2): the scaled
    sum-of-squares of the j-th packed batch row in this lane group.
    """
    x = x_ref[...].astype(jnp.float32)
    # Grouped lane reduction + theta scaling in a single MXU pass.  Mosaic's
    # f32 matmul keeps f32-level accuracy here (verified vs. the f32 reference
    # at 1e-5); the kernel is HBM-bound so the MXU work is free.
    o_ref[...] = jnp.dot(x * x, sel_ref[...], preferred_element_type=jnp.float32)


def _vmem_budgets():
    """Returns (block_budget_bytes, vmem_limit_bytes), gated on the chip."""
    try:
        cap = int(getattr(pltpu.get_tpu_info(), "vmem_capacity_bytes", 0))
    except Exception:
        cap = 0
    if cap >= 96 * 1024 * 1024:
        # v5e / v6e: 128 MiB physical VMEM -- allow bigger resident blocks.
        return 48 * 1024 * 1024, 64 * 1024 * 1024
    # v7x (64 MiB physical, 32 MiB default scoped) or unknown: conservative.
    return 20 * 1024 * 1024, 32 * 1024 * 1024


def _packing(b, n):
    """Pick packing factor g and the number of rows processed by the kernel."""
    g_full = max(1, 128 // n) if n < 128 else 1
    if b == 0 or b % g_full == 0:
        return g_full, b                      # common case: no pad, no copy
    g = math.gcd(g_full, b)
    if 2 * g >= g_full:
        return g, b                           # <=2x density loss, still copy-free
    # Awkward batch size: keep full packing on the divisible prefix and handle
    # the short (< g_full row) tail in plain JAX.  The prefix slice costs one
    # extra HBM pass but only triggers for odd-ball batch sizes.
    return g_full, (b // g_full) * g_full


def _tile_rows(bp, w, g, in_itemsize, tb_cap, block_budget):
    """Biggest packed-row tile that fits the double-buffered VMEM budget."""
    lanes_in = -(-w // 128) * 128
    lanes_out = -(-g // 128) * 128            # output block is lane-padded in VMEM
    per_row = 2 * (lanes_in * in_itemsize + lanes_out * 4)   # double-buffered
    tb = max(8, block_budget // per_row)
    tb = min(tb, tb_cap)
    # Keep >= ~8 grid steps (when there's enough work) so the 'parallel' batch
    # axis still feeds both v7x TensorCores.
    tb = min(tb, max(256, -(-bp // 8)))
    tb = min(tb, bp)
    if tb < bp:
        tb = max(8, (tb // 8) * 8)            # sublane-aligned unless full dim
    return tb


def ynet_forward(theta, t, x, *, tb_cap=8192):
    """theta: (1,) param, t: (..., 1) (ignored), x: (..., n) -> (..., 1)."""
    del t  # t is not used in the YNet forward computation
    x = jnp.asarray(x)
    if x.dtype not in (jnp.float32, jnp.bfloat16, jnp.float16):
        # TODO(synk): float64 unsupported on TPU vector units; compute in f32.
        x = x.astype(jnp.float32)
    *lead, n = x.shape
    b = int(np.prod(lead)) if lead else 1
    xf = x.reshape(b, n)
    theta_f = jnp.asarray(theta, jnp.float32).reshape(())

    g, body = _packing(b, n)
    tail = b - body

    parts = []
    if body:
        bp = body // g
        w = g * n
        xb = xf if body == b else xf[:body]   # slice only on the rare tail-split path
        xp = xb.reshape(bp, w)                # contiguous row-major reshape -> free

        # theta-scaled block-diagonal selector: sel[l, j] = theta if l // n == j.
        row_grp = np.arange(w, dtype=np.int32) // n
        sel_np = row_grp[:, None] == np.arange(g, dtype=np.int32)[None, :]
        sel = theta_f * jnp.asarray(sel_np, jnp.float32)        # (w, g), a few KiB

        block_budget, vmem_limit = _vmem_budgets()
        tb = _tile_rows(bp, w, g, np.dtype(xp.dtype).itemsize, tb_cap, block_budget)
        grid = (pl.cdiv(bp, tb),)             # ragged last block: Pallas masks the write

        out = pl.pallas_call(
            _ynet_kernel,
            out_shape=jax.ShapeDtypeStruct((bp, g), jnp.float32),
            grid_spec=pltpu.PrefetchScalarGridSpec(
                num_scalar_prefetch=0,
                grid=grid,
                in_specs=[
                    # Scaled selector: constant block index -> single DMA,
                    # stays resident across all grid steps.
                    pl.BlockSpec((w, g), lambda i: (0, 0)),
                    # One packed batch tile per step; W kept whole.
                    pl.BlockSpec((tb, w), lambda i: (i, 0)),
                ],
                out_specs=pl.BlockSpec((tb, g), lambda i: (i, 0)),
            ),
            compiler_params=pltpu.CompilerParams(
                dimension_semantics=("parallel",),   # megacore split on v7x
                vmem_limit_bytes=vmem_limit,
            ),
        )(sel, xp)
        # out[i, j] is the result for original row i*g + j.
        parts.append(out.reshape(body))

    if tail:
        xt = xf[body:].astype(jnp.float32)    # < g rows, negligible work
        parts.append(theta_f * jnp.sum(xt * xt, axis=-1))

    out_rows = parts[0] if len(parts) == 1 else jnp.concatenate(parts)
    return out_rows.reshape(*lead, 1)


if __name__ == "__main__":
    key = jax.random.PRNGKey(0)
    k_t, k_x = jax.random.split(key)

    batch, channels, seq, n = 2, 4, 16, 16        # x: (2, 4, 16, 16)
    t = jax.random.uniform(k_t, (batch, channels, seq, 1), dtype=jnp.float32)
    x = jax.random.normal(k_x, (batch, channels, seq, n), dtype=jnp.float32)

    # Deterministic parameter init, matching torch.nn.Parameter(torch.tensor([-1.0]))
    theta = jnp.array([-1.0], dtype=jnp.float32)

    out = ynet_forward(theta, t, x)
    out = jax.block_until_ready(out)

    # Reference check in plain JAX (float32).
    ref = theta * jnp.sum(x.astype(jnp.float32) ** 2, axis=-1, keepdims=True)
    assert out.shape == (batch, channels, seq, 1), out.shape
    np.testing.assert_allclose(np.asarray(out), np.asarray(ref), rtol=1e-5, atol=1e-5)

    print("KERNEL_OK")
</pallas_src>

<mosaic_0001>
module attributes {stable_mosaic.version = 11 : i64} {
  func.func @_ynet_kernel(%arg0: i32, %arg1: memref<128x8xf32, #tpu.memory_space<vmem>>, %arg2: memref<16x128xf32, #tpu.memory_space<vmem>>, %arg3: memref<16x8xf32, #tpu.memory_space<vmem>>) attributes {dimension_semantics = [#tpu.dimension_semantics<parallel>], iteration_bounds = array<i64: 1>, scalar_prefetch = 0 : i64, scratch_operands = 0 : i64, tpu.core_type = #tpu.core_type<tc>, window_params = [{pipeline_mode = #tpu.pipeline_mode<synchronous>, transform_indices = @transform_0, window_bounds = array<i64: 128, 8>}, {transform_indices = @transform_1, window_bounds = array<i64: 16, 128>}, {transform_indices = @transform_2, window_bounds = array<i64: 16, 8>}]} {
    %c0 = arith.constant 0 : index
    %c0_0 = arith.constant 0 : index
    %0 = vector.load %arg2[%c0, %c0_0] : memref<16x128xf32, #tpu.memory_space<vmem>>, vector<16x128xf32>
    %1 = arith.mulf %0, %0 : vector<16x128xf32>
    %c0_1 = arith.constant 0 : index
    %c0_2 = arith.constant 0 : index
    %2 = vector.load %arg1[%c0_1, %c0_2] : memref<128x8xf32, #tpu.memory_space<vmem>>, vector<128x8xf32>
    %cst = arith.constant dense<0.000000e+00> : vector<16x8xf32>
    %3 = tpu.matmul %1, %2, %cst {dimension_numbers = #tpu.dot_dimension_numbers<[1], [0], [0], [1], [0, 0, 1, 1], [], []>} : vector<16x128xf32>, vector<128x8xf32>, vector<16x8xf32> -> vector<16x8xf32>
    %c0_3 = arith.constant 0 : index
    %c0_4 = arith.constant 0 : index
    %4 = vector.load %arg3[%c0_3, %c0_4] : memref<16x8xf32, #tpu.memory_space<vmem>>, vector<16x8xf32>
    tpu.vector_store %arg3[%c0_3, %c0_4], %3 {strides = array<i32>} : memref<16x8xf32, #tpu.memory_space<vmem>>, vector<16x8xf32>,
    return
  }
  func.func @transform_0(%arg0: i32) -> (i32, i32) {
    %c0_i32 = arith.constant 0 : i32
    %c0_i32_0 = arith.constant 0 : i32
    %c0_i32_1 = arith.constant 0 : i32
    return %c0_i32, %c0_i32_0 : i32, i32
  }
  func.func @transform_1(%arg0: i32) -> (i32, i32) {
    %c0_i32 = arith.constant 0 : i32
    %c0_i32_0 = arith.constant 0 : i32
    return %arg0, %c0_i32 : i32, i32
  }
  func.func @transform_2(%arg0: i32) -> (i32, i32) {
    %c0_i32 = arith.constant 0 : i32
    %c0_i32_0 = arith.constant 0 : i32
    return %arg0, %c0_i32 : i32, i32
  }
}

</mosaic_0001>

<bundles_post_ra>
// kernel: tpu_custom_call.1
= control target key start
LH: loop header
LB: loop body
LE: loop exit
PB: predicated region body
PF: predicated region fallthrough
CT: control target
= control target key end

     0   :  { %vm54_vm0 = vcmask 64512   ;;  %s152_s0 = inlined_call_operand.vmem [shape: f32[128,8], index: 0, kind: input, shape index: {}]   ;;  %s153_s1 = inlined_call_operand.vmem [shape: f32[16,128], index: 1, kind: input, shape index: {}]   ;;  %s154_s2 = inlined_call_operand.vmem [shape: f32[16,8], index: 2, kind: output, shape index: {}]  }
   0x1   :  { %v30_v0 = vld [vmem:[%s152_s0 + $0x78] sm:$0xff]  ;;  %v29_v1 = vld [vmem:[%s152_s0 + $0x70] sm:$0xff]  ;;  %v28_v2 = vld [vmem:[%s152_s0 + $0x68] sm:$0xff] }
   0x2   :  { %31 = vmatpush.msra.mxu0 %v30_v0  ;;  %61 = vmatpush.msra.mxu1 %v30_v0  ;;  %v27_v3 = vld [vmem:[%s152_s0 + $0x60] sm:$0xff]  ;;  %v26_v4 = vld [vmem:[%s152_s0 + $0x58] sm:$0xff]  ;;  %v25_v5 = vld [vmem:[%s152_s0 + $0x50] sm:$0xff] }
   0x3   :  { %v24_v6 = vld [vmem:[%s152_s0 + $0x48] sm:$0xff]  ;;  %v23_v7 = vld [vmem:[%s152_s0 + $0x40] sm:$0xff]  ;;  %v22_v8 = vld [vmem:[%s152_s0 + $0x38] sm:$0xff] }
   0x4   :  { %32 = vmatpush.msra.mxu0 %v29_v1  ;;  %62 = vmatpush.msra.mxu1 %v29_v1  ;;  %v21_v9 = vld [vmem:[%s152_s0 + $0x30] sm:$0xff]  ;;  %v20_v10 = vld [vmem:[%s152_s0 + $0x28] sm:$0xff]  ;;  %v19_v11 = vld [vmem:[%s152_s0 + $0x20] sm:$0xff] }
   0x5   :  { %v18_v12 = vld [vmem:[%s152_s0 + $0x18] sm:$0xff]  ;;  %v17_v13 = vld [vmem:[%s152_s0 + $0x10] sm:$0xff]  ;;  %v11_v14 = vld [vmem:[%s153_s1] sm:$0xff] }
   0x6   :  { %33 = vmatpush.msra.mxu0 %v28_v2  ;;  %63 = vmatpush.msra.mxu1 %v28_v2  ;;  %v12_v15 = vld [vmem:[%s153_s1 + $0x8] sm:$0xff]  ;;  %v15_v17 = vld [vmem:[%s152_s0] sm:$0xff]  ;;  %v13_v18 = vmul.f32 %v11_v14, %v11_v14 }
   0x7   :  { %v16_v16 = vld [vmem:[%s152_s0 + $0x8] sm:$0xff]  ;;  %v14_v19 = vmul.f32 %v12_v15, %v12_v15 }
   0x8   :  { %34 = vmatpush.msra.mxu0 %v27_v3  ;;  %64 = vmatpush.msra.mxu1 %v27_v3 }
   0xa   :  { %35 = vmatpush.msra.mxu0 %v26_v4  ;;  %65 = vmatpush.msra.mxu1 %v26_v4 }
   0xc   :  { %36 = vmatpush.msra.mxu0 %v25_v5  ;;  %66 = vmatpush.msra.mxu1 %v25_v5 }
   0xe   :  { %37 = vmatpush.msra.mxu0 %v24_v6  ;;  %67 = vmatpush.msra.mxu1 %v24_v6 }
  0x10   :  { %38 = vmatpush.msra.mxu0 %v23_v7  ;;  %68 = vmatpush.msra.mxu1 %v23_v7 }
  0x12   :  { %39 = vmatpush.msra.mxu0 %v22_v8  ;;  %69 = vmatpush.msra.mxu1 %v22_v8 }
  0x14   :  { %40 = vmatpush.msra.mxu0 %v21_v9  ;;  %70 = vmatpush.msra.mxu1 %v21_v9 }
  0x16   :  { %41 = vmatpush.msra.mxu0 %v20_v10  ;;  %71 = vmatpush.msra.mxu1 %v20_v10 }
  0x18   :  { %42 = vmatpush.msra.mxu0 %v19_v11  ;;  %72 = vmatpush.msra.mxu1 %v19_v11 }
  0x1a   :  { %43 = vmatpush.msra.mxu0 %v18_v12  ;;  %73 = vmatpush.msra.mxu1 %v18_v12 }
  0x1c   :  { %44 = vmatpush.msra.mxu0 %v17_v13  ;;  %74 = vmatpush.msra.mxu1 %v17_v13 }
  0x1e   :  { %45 = vmatpush.msra.mxu0 %v16_v16  ;;  %75 = vmatpush.msra.mxu1 %v16_v16 }
  0x20   :  { %46 = vmatpush.msra.mxu0 %v15_v17  ;;  %76 = vmatpush.msra.mxu1 %v15_v17 }
  0x21   :  { %47 = vmatmul.f32.vlgmr.msra.gmra.mxu0 %v13_v18  ;;  %50 = vmatmul.f32.vlgmr.msra.gmra.mxu1 %v14_v19 }
  0x9e   :  { %v48_v20 = vpop.f32.mrf.mxu0  ;;  %v51_v21 = vpop.f32.mrf.mxu1 }
  0x9f   :  { %55 = vst.msk [vmem:[%s154_s2] sm:$0xff] %vm54_vm0, %v48_v20 }
  0xa0   :  { %56 = vst.msk [vmem:[%s154_s2 + $0x8] sm:$0xff] %vm54_vm0, %v51_v21 }

</bundles_post_ra>
